<compile_context>
chip_gen: v7x
topology: tpu7x:2x2x1
jax: 0.10.0
libtpu: 0.0.40
codegen_flags: <defaults>
</compile_context>

<pallas_src>
import jax
import jax.numpy as jnp
from jax.experimental import pallas as pl
from jax.experimental.pallas import tpu as pltpu


# ----------------------------- Pallas kernel ---------------------------------
def xpos_apply_kernel(x_ref, tab_ref, o_ref):
    # x block: (1, TL, W); tab block: (2, TL, W) = [sign-folded sin, cos]; same dtype as x.
    x = x_ref[0]                 # (TL, W), native dtype (no f32 round trip)
    sin_s = tab_ref[0]           # [..., 2i] = -sin_i * scale_i, [..., 2i+1] = +sin_i * scale_i
    cos_d = tab_ref[1]           # duplicate-interleaved cos * scale
    TL, W = x.shape

    lane = jax.lax.broadcasted_iota(jnp.int32, (TL, W), 1)
    # |rotate_every_two(x)|: even lane j -> x[..., j+1], odd lane j -> x[..., j-1].
    # Sign of the even lanes is folded into sin_s.  pltpu.roll is circular; the wrapped
    # lanes are never selected by the parity select (W is even, pairs never cross lane 0/W-1).
    rot = jnp.where(
        (lane & 1) == 0,
        pltpu.roll(x, shift=W - 1, axis=1),    # roll by -1: lane j becomes x[..., j+1]
        pltpu.roll(x, shift=1, axis=1),        # roll by +1: lane j becomes x[..., j-1]
    )
    o_ref[0] = (x * cos_d + rot * sin_s).astype(o_ref.dtype)


# ----------------------------- table construction ----------------------------
def make_xpos_scale(head_dim):
    # Matches: (torch.arange(0, head_dim, 2) + 0.4*head_dim) / (1.4*head_dim)
    return (jnp.arange(0, head_dim, 2, dtype=jnp.float32) + 0.4 * head_dim) / (1.4 * head_dim)


def _build_table(scale_buf, L, D, scale_base, offset, downscale, reverse):
    """(2, L, D) float32 table: [0] = sign-folded interleaved sin*scale, [1] = cos*scale."""
    half = D // 2
    min_pos = -(L + offset) // 2 if reverse else 0
    max_pos = L + offset + min_pos
    n = max_pos - min_pos

    power = jnp.arange(min_pos, max_pos, dtype=jnp.float32) / scale_base        # (n,)
    scale = scale_buf[None, :].astype(jnp.float32) ** power[:, None]            # (n, half)

    # fixed_pos_embedding on the (n, half) scale tensor
    inv_freq = 1.0 / (10000.0 ** (jnp.arange(0, half, dtype=jnp.float32) / half))
    sinusoid = jnp.arange(0, n, dtype=jnp.float32)[:, None] * inv_freq[None, :]
    sin, cos = jnp.sin(sinusoid), jnp.cos(sinusoid)

    if n > L:
        scale, sin, cos = scale[-L:], sin[-L:], cos[-L:]
    if downscale:
        scale = 1.0 / scale

    sgn = -1.0 if reverse else 1.0
    sin_h = sgn * sin * scale                  # (L, half)
    cos_h = cos * scale                        # (L, half)
    # rotate_every_two sign folded into sin:
    #   out[..., 2i]   = x[2i]*cos_i - x[2i+1]*sin_i
    #   out[..., 2i+1] = x[2i+1]*cos_i + x[2i]*sin_i
    sin_signed = jnp.stack([-sin_h, sin_h], axis=-1).reshape(L, D)
    cos_dup = jnp.stack([cos_h, cos_h], axis=-1).reshape(L, D)   # == duplicate_interleave
    return jnp.stack([sin_signed, cos_dup], axis=0)              # (2, L, D)


# ----------------------------- tiling helpers ---------------------------------
def _choose_merge(L, D, target_lanes=128):
    """Smallest row-merge factor k (divisor of L) with k*D >= 128 lanes.

    Prefers k*D a multiple of 128 (fully unmasked vector stores); returns 1 if no
    suitable divisor exists (or if D is already >= 128).
    """
    if D >= target_lanes:
        return 1
    k_min = -(-target_lanes // D)  # ceil(128 / D)
    best_any = None
    for k in range(k_min, L + 1):
        if L % k == 0:
            if (k * D) % target_lanes == 0:
                return k
            if best_any is None:
                best_any = k
    return best_any if best_any is not None else 1


def _choose_tile_l(Lm, W, itemsize, target_bytes=2 << 20):
    """Sublane-aligned L tile whose (TL, W) x-block is ~<= target_bytes.

    Prefers an aligned divisor of Lm (clean grid).  If none exists, returns an aligned
    tile anyway -- the grid uses pl.cdiv and Pallas masks the ragged last block.
    There is deliberately NO "full L" fallback (VMEM hazard for long sequences).
    """
    align = 8 if itemsize >= 4 else (16 if itemsize == 2 else 32)
    if Lm <= align:
        return Lm                                   # full dim -> always legal
    max_tl = max(align, (target_bytes // max(1, W * itemsize)) // align * align)
    best_div = None
    tl = align
    while tl <= min(Lm, max_tl):
        if Lm % tl == 0:
            best_div = tl
        tl += align
    if best_div is not None:
        return best_div
    return int(min(max_tl, (Lm // align) * align))  # ragged last block, masked by Pallas


# ----------------------------- pallas_call wrapper -----------------------------
def _xpos_apply(x, table, tl=None, target_bytes=2 << 20):
    B, L, D = x.shape
    assert D % 2 == 0, "XPOS head_dim must be even"

    # Lane-dense layout: merge k consecutive rows so the last dim is >= 128 lanes.
    k = _choose_merge(L, D)
    Lm, W = L // k, k * D
    x_m = x.reshape(B, Lm, W)
    tab_m = table.reshape(2, Lm, W)

    itemsize = jnp.dtype(x.dtype).itemsize
    if tl is None:
        tl = _choose_tile_l(Lm, W, itemsize, target_bytes)
    assert tl == Lm or tl % 8 == 0, (Lm, tl)
    num_l = int(pl.cdiv(Lm, tl))

    # VMEM limit from the actual double-buffered working set (+50% headroom), not a fixed 48 MiB.
    blk = tl * W * itemsize                         # one x block
    working_set = 2 * (4 * blk)                     # (x + out + 2 table planes) * 2 buffers
    vmem_limit = int(min(64 << 20, max(16 << 20, working_set * 3 // 2 + (2 << 20))))

    # >=2 L tiles: force the megacore split onto L (table stays per-core resident);
    # otherwise B is the only shardable axis.  No-op on single-core v5e/v6e.
    dims = ("parallel", "arbitrary") if num_l >= 2 else ("parallel", "parallel")

    out = pl.pallas_call(
        xpos_apply_kernel,
        out_shape=jax.ShapeDtypeStruct((B, Lm, W), x.dtype),
        grid_spec=pltpu.PrefetchScalarGridSpec(
            num_scalar_prefetch=0,
            # L tiles outer, batch inner (fastest): the table block index is constant across
            # consecutive steps, so Pallas does not re-DMA sin/cos per batch element.
            grid=(num_l, B),
            in_specs=[
                pl.BlockSpec((1, tl, W), lambda l, b: (b, l, 0)),
                pl.BlockSpec((2, tl, W), lambda l, b: (0, l, 0)),
            ],
            out_specs=pl.BlockSpec((1, tl, W), lambda l, b: (b, l, 0)),
        ),
        compiler_params=pltpu.CompilerParams(
            dimension_semantics=dims,
            vmem_limit_bytes=vmem_limit,
        ),
    )(x_m, tab_m)
    return out.reshape(B, L, D)


# ----------------------------- user-facing module ------------------------------
class XPOS:
    """JAX/Pallas port of the PyTorch XPOS module (forward + forward_reverse)."""

    def __init__(self, head_dim, scale_base=512):
        self.head_dim = head_dim
        self.scale_base = scale_base
        self.scale = make_xpos_scale(head_dim)
        self._table_cache = {}   # (L, offset, downscale, reverse, dtype) -> (2, L, D) table

    def _table(self, L, offset, downscale, reverse, dtype):
        key = (L, offset, bool(downscale), bool(reverse), jnp.dtype(dtype).name)
        tab = self._table_cache.get(key)
        if tab is None:
            tab = _build_table(self.scale, L, self.head_dim, self.scale_base,
                               offset, downscale, reverse).astype(dtype)
            self._table_cache[key] = tab
        return tab

    def forward(self, x, offset=0, downscale=False, tl=None):
        B, L, D = x.shape
        assert D == self.head_dim
        table = self._table(L, offset, downscale, False, x.dtype)
        return _xpos_apply(x, table, tl=tl)

    def forward_reverse(self, x, offset=0, downscale=False, tl=None):
        B, L, D = x.shape
        assert D == self.head_dim
        table = self._table(L, offset, downscale, True, x.dtype)
        return _xpos_apply(x, table, tl=tl)


# ----------------------------- pure-JAX reference -----------------------------
def _ref_forward(x, scale_buf, scale_base=512, offset=0, downscale=False, reverse=False):
    B, L, D = x.shape
    half = D // 2
    min_pos = -(L + offset) // 2 if reverse else 0
    max_pos = L + offset + min_pos
    power = jnp.arange(min_pos, max_pos, dtype=jnp.float32) / scale_base
    scale = scale_buf[None, :].astype(jnp.float32) ** power[:, None]
    n = scale.shape[0]
    inv_freq = 1.0 / (10000.0 ** (jnp.arange(0, half, dtype=jnp.float32) / half))
    sinusoid = jnp.arange(0, n, dtype=jnp.float32)[:, None] * inv_freq[None, :]
    sin, cos = jnp.sin(sinusoid), jnp.cos(sinusoid)
    if n > L:
        scale, sin, cos = scale[-L:], sin[-L:], cos[-L:]
    if downscale:
        scale = 1.0 / scale
    sgn = -1.0 if reverse else 1.0
    sin_d = jnp.repeat(sgn * sin * scale, 2, axis=1)   # duplicate_interleave
    cos_d = jnp.repeat(cos * scale, 2, axis=1)
    xf = x.astype(jnp.float32)
    x1, x2 = xf[:, :, ::2], xf[:, :, 1::2]
    rot = jnp.stack((-x2, x1), axis=-1).reshape(B, L, D)
    return xf * cos_d + rot * sin_d


if __name__ == "__main__":
    key = jax.random.PRNGKey(0)
    k1, k2, k3 = jax.random.split(key, 3)

    # 1) head_dim = 128 (already lane-dense), f32; forward / offset+downscale / reverse
    B, L, D = 2, 16, 128
    xpos = XPOS(D, scale_base=512)
    x = jax.random.normal(k1, (B, L, D), dtype=jnp.float32)

    out = jax.block_until_ready(xpos.forward(x))
    ref = _ref_forward(x, xpos.scale, 512)
    assert out.shape == (B, L, D)
    assert jnp.allclose(out, ref, atol=1e-5, rtol=1e-5), float(jnp.max(jnp.abs(out - ref)))

    out2 = jax.block_until_ready(xpos.forward(x, offset=4, downscale=True))
    ref2 = _ref_forward(x, xpos.scale, 512, offset=4, downscale=True)
    assert jnp.allclose(out2, ref2, atol=1e-5, rtol=1e-5), float(jnp.max(jnp.abs(out2 - ref2)))

    out3 = jax.block_until_ready(xpos.forward_reverse(x, offset=2))
    ref3 = _ref_forward(x, xpos.scale, 512, offset=2, reverse=True)
    assert jnp.allclose(out3, ref3, atol=1e-5, rtol=1e-5), float(jnp.max(jnp.abs(out3 - ref3)))

    # second call hits the per-(L, offset, downscale, reverse, dtype) table cache
    out1b = jax.block_until_ready(xpos.forward(x))
    assert jnp.allclose(out1b, ref, atol=1e-5, rtol=1e-5)

    # 2) head_dim = 64: exercises the lane-merge (k=2 -> 128-wide lanes) and, with a forced
    #    small tile, the multi-L-tile grid with the table resident across the inner batch axis.
    B2, L2, D2 = 2, 32, 64
    xpos64 = XPOS(D2, scale_base=512)
    x64 = jax.random.normal(k2, (B2, L2, D2), dtype=jnp.float32)
    out64 = jax.block_until_ready(xpos64.forward(x64))
    ref64 = _ref_forward(x64, xpos64.scale, 512)
    assert jnp.allclose(out64, ref64, atol=1e-5, rtol=1e-5), float(jnp.max(jnp.abs(out64 - ref64)))
    out64b = jax.block_until_ready(xpos64.forward(x64, tl=8))   # merged L' = 16 -> 2 L tiles
    assert jnp.allclose(out64b, ref64, atol=1e-5, rtol=1e-5), float(jnp.max(jnp.abs(out64b - ref64)))

    # 3) bf16 path: bf16 table + native bf16 compute (looser tolerance vs f32 reference)
    B3, L3, D3 = 2, 32, 128
    xpos_bf = XPOS(D3, scale_base=512)
    x_bf = jax.random.normal(k3, (B3, L3, D3), dtype=jnp.float32).astype(jnp.bfloat16)
    out_bf = jax.block_until_ready(xpos_bf.forward(x_bf))
    ref_bf = _ref_forward(x_bf, xpos_bf.scale, 512)
    assert out_bf.dtype == jnp.bfloat16
    err = float(jnp.max(jnp.abs(out_bf.astype(jnp.float32) - ref_bf)))
    assert err < 6e-2, err

    print("KERNEL_OK")
</pallas_src>

<mosaic_0001>
module attributes {stable_mosaic.version = 11 : i64} {
  func.func @xpos_apply_kernel(%arg0: i32, %arg1: i32, %arg2: memref<1x16x128xf32, #tpu.memory_space<vmem>>, %arg3: memref<2x16x128xf32, #tpu.memory_space<vmem>>, %arg4: memref<1x16x128xf32, #tpu.memory_space<vmem>>) attributes {dimension_semantics = [#tpu.dimension_semantics<parallel>, #tpu.dimension_semantics<parallel>], iteration_bounds = array<i64: 1, 2>, scalar_prefetch = 0 : i64, scratch_operands = 0 : i64, tpu.core_type = #tpu.core_type<tc>, window_params = [{transform_indices = @transform_0, window_bounds = array<i64: 1, 16, 128>}, {transform_indices = @transform_1, window_bounds = array<i64: 2, 16, 128>}, {transform_indices = @transform_2, window_bounds = array<i64: 1, 16, 128>}]} {
    %c0 = arith.constant 0 : index
    %c0_0 = arith.constant 0 : index
    %c0_1 = arith.constant 0 : index
    %0 = vector.load %arg2[%c0, %c0_0, %c0_1] : memref<1x16x128xf32, #tpu.memory_space<vmem>>, vector<1x16x128xf32>
    %1 = vector.shape_cast %0 : vector<1x16x128xf32> to vector<16x128xf32>
    %c0_2 = arith.constant 0 : index
    %c0_3 = arith.constant 0 : index
    %c0_4 = arith.constant 0 : index
    %2 = vector.load %arg3[%c0_2, %c0_3, %c0_4] : memref<2x16x128xf32, #tpu.memory_space<vmem>>, vector<1x16x128xf32>
    %3 = vector.shape_cast %2 : vector<1x16x128xf32> to vector<16x128xf32>
    %c1 = arith.constant 1 : index
    %c0_5 = arith.constant 0 : index
    %c0_6 = arith.constant 0 : index
    %4 = vector.load %arg3[%c1, %c0_5, %c0_6] : memref<2x16x128xf32, #tpu.memory_space<vmem>>, vector<1x16x128xf32>
    %5 = vector.shape_cast %4 : vector<1x16x128xf32> to vector<16x128xf32>
    %6 = tpu.iota {dimensions = array<i32: 1>} : vector<16x128xi32>
    %c1_i32 = arith.constant 1 : i32
    %7 = vector.broadcast %c1_i32 : i32 to vector<16x128xi32>
    %8 = arith.andi %6, %7 : vector<16x128xi32>
    %c0_i32 = arith.constant 0 : i32
    %9 = vector.broadcast %c0_i32 : i32 to vector<16x128xi32>
    %10 = arith.cmpi eq, %8, %9 : vector<16x128xi32>
    %c127_i32 = arith.constant 127 : i32
    %11 = tpu.dynamic_rotate %1 by %c127_i32 dim 1 : vector<16x128xf32>, i32 -> vector<16x128xf32>
    %c1_i32_7 = arith.constant 1 : i32
    %12 = tpu.dynamic_rotate %1 by %c1_i32_7 dim 1 : vector<16x128xf32>, i32 -> vector<16x128xf32>
    %13 = arith.select %10, %11, %12 : vector<16x128xi1>, vector<16x128xf32>
    %14 = arith.mulf %1, %5 : vector<16x128xf32>
    %15 = arith.mulf %13, %3 : vector<16x128xf32>
    %16 = arith.addf %14, %15 : vector<16x128xf32>
    %c0_8 = arith.constant 0 : index
    %c0_9 = arith.constant 0 : index
    %c0_10 = arith.constant 0 : index
    %17 = vector.load %arg4[%c0_8, %c0_9, %c0_10] : memref<1x16x128xf32, #tpu.memory_space<vmem>>, vector<1x16x128xf32>
    %18 = vector.shape_cast %17 : vector<1x16x128xf32> to vector<16x128xf32>
    %19 = vector.shape_cast %16 : vector<16x128xf32> to vector<1x16x128xf32>
    tpu.vector_store %arg4[%c0_8, %c0_9, %c0_10], %19 {strides = array<i32>} : memref<1x16x128xf32, #tpu.memory_space<vmem>>, vector<1x16x128xf32>,
    return
  }
  func.func @transform_0(%arg0: i32, %arg1: i32) -> (i32, i32, i32) {
    %c0_i32 = arith.constant 0 : i32
    %c0_i32_0 = arith.constant 0 : i32
    return %arg1, %arg0, %c0_i32 : i32, i32, i32
  }
  func.func @transform_1(%arg0: i32, %arg1: i32) -> (i32, i32, i32) {
    %c0_i32 = arith.constant 0 : i32
    %c0_i32_0 = arith.constant 0 : i32
    %c0_i32_1 = arith.constant 0 : i32
    return %c0_i32, %arg0, %c0_i32_0 : i32, i32, i32
  }
  func.func @transform_2(%arg0: i32, %arg1: i32) -> (i32, i32, i32) {
    %c0_i32 = arith.constant 0 : i32
    %c0_i32_0 = arith.constant 0 : i32
    return %arg1, %arg0, %c0_i32 : i32, i32, i32
  }
}

</mosaic_0001>

<bundles_post_ra>
// kernel: tpu_custom_call.1
= control target key start
LH: loop header
LB: loop body
LE: loop exit
PB: predicated region body
PF: predicated region fallthrough
CT: control target
= control target key end

     0   :  { %7 = vsyncpa [#allocation3], 0  ;;  %s851_s0 = inlined_call_operand.hbm [shape: f32[2,16,128], index: 0, kind: input, shape index: {}]   ;;  %s852_s1 = inlined_call_operand.hbm [shape: f32[2,16,128], index: 1, kind: input, shape index: {}]   ;;  %s853_s2 = inlined_call_operand.hbm [shape: f32[2,16,128], index: 2, kind: output, shape index: {}]  }
   0x1   :  { %9 = vsyncpa [#allocation3 + $0x1], 0 }
   0x2   :  { %10 = vsyncpa [#allocation6], 0 }
   0x3   :  { %11 = vsyncpa [#allocation4], 0 }
   0x4   :  { %13 = vsyncpa [#allocation4 + $0x1], 0  ;;  %s618_s9 = smov 0   ;;  %s620_s10 = smov 0  }
   0x5   :  { %s622_s11 = smov 0   ;;  %s624_s12 = smov 0  }
   0x6   :  { %s626_s13 = smov 0   ;;  %s628_s14 = smov 0  }
   0x7 LB: > { %s350_s15 = sadd.s32 4294967295, %s592_s14   ;;  %s351_s16 = sadd.s32 4294967294, %s592_s14   ;;  %s592_s14 = sphi %s628_s14, %s19_s14   ;;  %s588_s13 = sphi %s626_s13, %s879_s13   ;;  %s584_s12 = sphi %s624_s12, %s878_s12   ;;  %s580_s11 = sphi %s622_s11, %s877_s11   ;;  %s576_s10 = sphi %s620_s10, %s876_s10   ;;  %s572_s9 = sphi %s618_s9, %s875_s9  }
   0x8   : > { %p53_p0 = scmp.ne.s32.totalorder %s576_s10, %s572_s9  ;;  %p652_p1 = scmp.eq.s32.totalorder %s350_s15, 0 }
   0x9   : > { %p656_p2 = scmp.eq.s32.totalorder %s350_s15, 1  ;;  %p111_p3 = scmp.eq.s32.totalorder %s351_s16, 1 }
   0xa   : > { %s858_s17 = scalar_select %p652_p1, 1, 0 }
   0xb   : > { %s859_s18 = scalar_select %p656_p2, 1, 0 }
   0xc   : > { %p662_p4 = por %p652_p1, %p53_p0  ;;  %p352_p5 = scmp.ge.s32.totalorder %s592_s14, 1 }
   0xd   : > { %p667_p6 = por %p111_p3, %p53_p0  ;;  %p118_p7 = scmp.lt.s32.totalorder %s592_s14, 3 }
   0xe   : > { %s860_s19 = scalar_select %p662_p4, 1, 0 }
   0xf   : > { %s861_s20 = scalar_select %p667_p6, 1, 0 }
  0x10   : > { %p672_p8 = pnand %p352_p5, %p118_p7  ;;  %s594_s22 = smov [#allocation5]  }
  0x11   : > { %s133_s23 = sshll.u32 %s594_s22, 4  ;;  %s28_s25 = sadd.s32 1, %s588_s13  ;;  %s134_s23 = int_to_ptr.vmem [resolvable:$true] %s133_s23 }
  0x12   : > { %s862_s21 = scalar_select %p672_p8, 1, 0 }
  0x13   : > { %p377_p9 = pneg %p672_p8  ;;  %s448_s28 = scalar_lea.hbm %s852_s1, 512 }
  0x14   : > { %p449_p12 = scmp.ne.s32.totalorder %s852_s1, %s448_s28  ;;  %p455_p5 = scmp.lt.u32.totalorder %s448_s28, %s852_s1 }
  0x15   : > { %p681_p11 = pnand %p377_p9, %p652_p1 }
  0x17   : > { %p450_p13 = pneg %p681_p11 }
  0x19   : > { %p451_p0 = pnand %p450_p13, %p449_p12 }
  0x1b   : > { %p452_p3 = pneg %p451_p0 }
  0x1d   : > { %p457_p7 = pnand %p455_p5, %p452_p3 }
  0x1f   : > { %460 = shalt.err (!%p457_p7)
}
  0x20   : > { %s461_s5 = scalar_lea.vmem %s134_s23, 512  ;;  %p469_p1 = scmp.lt.s32.totalorder %s134_s23, %s134_s23 }
  0x21   : > { %p462_p9 = scmp.ne.s32.totalorder %s134_s23, %s461_s5  ;;  %p470_p4 = scmp.lt.s32.totalorder %s461_s5, %s461_s5 }
  0x23   : > { %p464_p10 = pnand %p462_p9, %p450_p13  ;;  %p471_p8 = por %p470_p4, %p469_p1 }
  0x25   : > { %p465_p6 = pneg %p464_p10 }
  0x27   : > { %p472_p2 = pnand %p471_p8, %p465_p6 }
  0x29   : > { %475 = shalt.err (!%p472_p2)
}
  0x2a   : > { %s595_s6 = smov 128   ;;  %s596_s7 = smov 8  }
  0x2b   : > { %380 = dma.hbm_to_vmem [thread:$0]  (!%p681_p11), %s852_s1, 512, %s134_s23, [#allocation6], %s595_s6, %s595_s6, %s596_s7  }
  0x2c   : > { %p29_p1 = scmp.ge.s32.totalorder %s28_s25, 2  ;;  %s40_s16 = sadd.s32 1, %s580_s11 }
  0x2d   : > { %p47_p2 = scmp.ne.s32.totalorder %s580_s11, %s576_s10  ;;  %p48_p4 = scmp.eq.s32.totalorder %s592_s14, 0 }
  0x2e   : > { %s881_s25 = smov (%p29_p1, %s28_s25), 0  ;;  %p865_p8 = scmp.ne.s32.totalorder %s859_s18, 0 }
  0x2f   : > { %p711_p6 = por %p48_p4, %p47_p2  ;;  %s35_s26 = ssub.s32 %s588_s13, %s881_s25 }
  0x30   : > { %p717_p10 = por %p865_p8, %p47_p2  ;;  %p390_p12 = scmp.lt.s32.totalorder %s592_s14, 2 }
  0x31   : > { %p38_p11 = scmp.eq.s32.totalorder %s35_s26, 0  ;;  %s147_s23 = sand.u32 1, %s580_s11  }
  0x32   : > { %s355_s27 = sshll.u32 %s147_s23, 4  ;;  %s367_s29 = sshll.u32 %s588_s13, 8 }
  0x33   : > { %s726_s28 = scalar_select %p38_p11, %s580_s11, %s40_s16  }
  0x34   : > { %s732_s4 = scalar_lea.hbm %s851_s0, %s367_s29  ;;  %s151_s18 = scalar_lea.vmem [#allocation2], %s355_s27 }
  0x35   : > { %s160_s5 = sshll.u32 %s151_s18, 4  ;;  %p738_p13 = pnand %p390_p12, %p711_p6  ;;  %s734_s5 = int_to_ptr.vmem [resolvable:$true] %s160_s5 }
  0x36   : > { %s742_s15 = scalar_lea.sflag [#allocation3], %s147_s23  ;;  %s476_s16 = scalar_lea.hbm %s732_s4, 256 }
  0x37   : > { %p477_p0 = scmp.ne.s32.totalorder %s732_s4, %s476_s16  ;;  %p478_p3 = pneg %p738_p13 }
  0x38   : > { %s481_s22 = scalar_lea.hbm %s851_s0, 512  ;;  %p482_p9 = scmp.lt.u32.totalorder %s732_s4, %s851_s0 }
  0x39   : > { %p479_p5 = pnand %p478_p3, %p477_p0  ;;  %p483_p1 = scmp.lt.u32.totalorder %s481_s22, %s476_s16 }
  0x3a   : > { %p485_p4 = scmp.lt.u32.totalorder %s476_s16, %s732_s4 }
  0x3b   : > { %p480_p7 = pneg %p479_p5  ;;  %p484_p2 = por %p483_p1, %p482_p9 }
  0x3d   : > { %p486_p6 = por %p485_p4, %p484_p2 }
  0x3f   : > { %p487_p8 = pnand %p486_p6, %p480_p7 }
  0x41   : > { %490 = shalt.err (!%p487_p8)
}
  0x42   : > { %s491_s23 = scalar_lea.vmem %s734_s5, 256  ;;  %s597_s3 = smov [#allocation2]  }
  0x43   : > { %p492_p12 = scmp.ne.s32.totalorder %s734_s5, %s491_s23  ;;  %s496_s18 = sshll.u32 %s597_s3, 4  ;;  %s497_s18 = int_to_ptr.vmem [resolvable:$false] %s496_s18 }
  0x44   : > { %s498_s26 = scalar_lea.vmem %s497_s18, 512  ;;  %p499_p5 = scmp.lt.s32.totalorder %s734_s5, %s497_s18 }
  0x45   : > { %p494_p11 = pnand %p492_p12, %p478_p3  ;;  %p500_p9 = scmp.lt.s32.totalorder %s498_s26, %s491_s23 }
  0x47   : > { %p495_p0 = pneg %p494_p11  ;;  %p501_p1 = por %p500_p9, %p499_p5 }
  0x49   : > { %p502_p2 = pnand %p501_p1, %p495_p0 }
  0x4b   : > { %505 = shalt.err (!%p502_p2)
}
  0x4c   : > { %384 = dma.hbm_to_vmem [thread:$0]  (!%p738_p13), %s732_s4, 256, %s734_s5, %s742_s15, %s595_s6, %s595_s6, %s596_s7  }
  0x4d   : > { %p868_p3 = scmp.ne.s32.totalorder %s862_s21, 0 }
  0x4e   : > { %s776_s16 = sand.u32 (!%p868_p3), 1, %s576_s10   ;;  %p869_p7 = scmp.ne.s32.totalorder (!%p868_p3), %s860_s19, 0 }
  0x4f   : > { %172 = sbr.rel (%p868_p3) target bundleno = 230 (0xe6), region = 28  ;;  %s359_s27 = sshll.u32 (!%p868_p3), %s776_s16, 4 }
  0x50   : > { %s175_s22 = scalar_lea.sflag (!%p868_p3), [#allocation3], %s776_s16  ;;  %s178_s29 = scalar_lea.vmem (!%p868_p3), [#allocation2], %s359_s27 }
  0x56   : > { %559 = dma.done.wait (%p869_p7), %s175_s22, 256  }
  0x57   : > { %561 = vsyncadd (%p869_p7), %s175_s22, 4294967040  ;;  %p870_p4 = scmp.ne.s32.totalorder %s858_s17, 0 }
  0x59   : > { %563 = dma.done.wait (%p870_p4), [#allocation6], 512  }
  0x5a   : > { %565 = vsyncadd (%p870_p4), [#allocation6], 4294966784  ;;  %v206_v0 = vld [vmem:[%s178_s29] sm:$0xff]  ;;  %s598_s21 = smov 1   ;;  %s599_s6 = smov 127   ;;  %v207_v1 = vld [vmem:[%s178_s29 + $0x8] sm:$0xff]  ;;  %v213_v2 = vlaneseq }
  0x5b   : > { %221 = vrot.lane.b32.xlu1 %v206_v0, %s598_s21  ;;  %217 = vrot.lane.b32.xlu0 %v206_v0, %s599_s6  ;;  %v211_v5 = vld [vmem:[#allocation5 + $0x10] sm:$0xff]  ;;  %v208_v7 = vld [vmem:[#allocation5] sm:$0xff]  ;;  %v212_v11 = vld [vmem:[#allocation5 + $0x18] sm:$0xff]  ;;  %s202_s17 = scalar_lea.vmem [#allocation7], %s359_s27  ;;  %s368_s7 = sshll.u32 %s584_s12, 8 }
  0x5c   : > { %v214_v3 = vand.u32 127, %v213_v2  ;;  %v227_v8 = vmul.f32 %v211_v5, %v206_v0  ;;  %s251_s19 = sshll.u32 %s202_s17, 4  ;;  %v209_v14 = vld [vmem:[#allocation5 + $0x8] sm:$0xff]  ;;  %v228_v15 = vmul.f32 %v212_v11, %v207_v1  ;;  %s802_s8 = scalar_lea.hbm %s853_s2, %s368_s7  ;;  %s797_s19 = int_to_ptr.vmem [resolvable:$true] %s251_s19 }
  0x5d   : > { %s236_s15 = scalar_lea.sflag [#allocation4], %s776_s16  ;;  %s506_s30 = scalar_lea.vmem %s797_s19, 256 }
  0x5e   : > { %v215_v4 = vand.u32 1, %v214_v3  ;;  %p507_p13 = scmp.ne.s32.totalorder %s797_s19, %s506_s30  ;;  %s600_s12 = smov [#allocation7]  }
  0x5f   : > { %223 = vrot.lane.b32.xlu1 %v207_v1, %s598_s21  ;;  %219 = vrot.lane.b32.xlu0 %v207_v1, %s599_s6  ;;  %s510_s23 = sshll.u32 %s600_s12, 4  ;;  %s511_s23 = int_to_ptr.vmem [resolvable:$false] %s510_s23 }
  0x60   : > { %vm788_vm0 = vcmp.eq.s32.totalorder %v215_v4, 0  ;;  %p508_p6 = pnand %p507_p13, %p717_p10  ;;  %s512_s3 = scalar_lea.vmem %s511_s23, 512 }
  0x61   : > { %p513_p12 = scmp.lt.s32.totalorder %s797_s19, %s511_s23  ;;  %p514_p11 = scmp.lt.s32.totalorder %s512_s3, %s506_s30 }
  0x62   : > { %p509_p8 = pneg %p508_p6 }
  0x63   : > { %p515_p0 = por %p514_p11, %p513_p12 }
  0x65   : > { %p516_p5 = pnand %p515_p0, %p509_p8 }
  0xcd   : > { %v222_v9 = vpop.permute.xlu1 %221  ;;  %v218_v10 = vpop.permute.xlu0 %217 }
  0xce   : > { %v225_v12 = vsel %vm788_vm0, %v218_v10, %v222_v9 }
  0xcf   : > { %v229_v13 = vmul.f32 %v225_v12, %v208_v7 }
  0xd1   : > { %v231_v16 = vadd.f32 %v229_v13, %v227_v8  ;;  %v224_v17 = vpop.permute.xlu1 %223  ;;  %v220_v18 = vpop.permute.xlu0 %219 }
  0xd2   : > { %v226_v19 = vsel %vm788_vm0, %v220_v18, %v224_v17 }
  0xd3   : > { %233 = vst [vmem:[%s202_s17] sm:$0xff] %v231_v16  ;;  %v230_v20 = vmul.f32 %v226_v19, %v209_v14 }
  0xd5   : > { %v232_v21 = vadd.f32 %v230_v20, %v228_v15 }
  0xd7   : > { %234 = vst [vmem:[%s202_s17 + $0x8] sm:$0xff] %v232_v21 }
  0xd8   : > { %519 = shalt.err (!%p516_p5)
}
  0xd9   : > { %s520_s18 = scalar_lea.hbm %s802_s8, 256  ;;  %s524_s22 = scalar_lea.hbm %s853_s2, 512 }
  0xda   : > { %p521_p9 = scmp.ne.s32.totalorder %s802_s8, %s520_s18  ;;  %p525_p3 = scmp.lt.u32.totalorder %s802_s8, %s853_s2 }
  0xdb   : > { %p526_p7 = scmp.lt.u32.totalorder %s524_s22, %s520_s18  ;;  %p528_p13 = scmp.lt.u32.totalorder %s520_s18, %s802_s8 }
  0xdc   : > { %p522_p1 = pnand %p521_p9, %p717_p10 }
  0xdd   : > { %p527_p4 = por %p526_p7, %p525_p3 }
  0xde   : > { %p523_p2 = pneg %p522_p1 }
  0xdf   : > { %p529_p6 = por %p528_p13, %p527_p4 }
  0xe1   : > { %p530_p8 = pnand %p529_p6, %p523_p2 }
  0xe3   : > { %533 = shalt.err (!%p530_p8)
}
  0xe4   : > { %s601_s6 = smov 128   ;;  %s602_s17 = smov 8  }
  0xe5   : > { %375 = dma.vmem_to_hbm [thread:$0]  (%p717_p10), %s797_s19, 256, %s802_s8, %s236_s15, %s601_s6, %s601_s6, %s602_s17  }
  0xe6 PF: > { %s266_s7 = sand.u32 1, %s572_s9   ;;  %p873_p12 = scmp.ne.s32.totalorder %s861_s20, 0 }
  0xe7   : > { %p874_p11 = scmp.ge.s32.totalorder %s592_s14, 2  ;;  %s267_s4 = scalar_lea.sflag [#allocation4], %s266_s7 }
  0xe9   : > { %p386_p0 = pnand %p874_p11, %p873_p12 }
  0xeb   : > { %567 = dma.done.wait (!%p386_p0), %s267_s4, 256  }
  0xec   : > { %569 = vsyncadd (!%p386_p0), %s267_s4, 4294967040  ;;  %s19_s14 = sadd.s32 1, %s592_s14   ;;  %s875_s9 = smov %s576_s10 }
  0xed   : > { %p16_p5 = scmp.ge.s32.totalorder %s19_s14, 4   ;;  %s876_s10 = smov %s580_s11 }
  0xee   : > { %s877_s11 = smov %s726_s28  ;;  %s878_s12 = smov %s588_s13 }
  0xef   : > { %s879_s13 = smov %s881_s25  ;;  %18 = sbr.rel (!%p16_p5) target bundleno = 7 (0x7), region = 79 }
  0xf6   :  { %272 = vsyncpa [#allocation3], 1 }
  0xf7   :  { %274 = vsyncpa [#allocation3 + $0x1], 1 }
  0xf8   :  { %275 = vsyncpa [#allocation6], 1 }
  0xf9   :  { %276 = vsyncpa [#allocation4], 1 }
  0xfa   :  { %278 = vsyncpa [#allocation4 + $0x1], 1 }

</bundles_post_ra>
